<compile_context>
chip_gen: v5e
topology: v5e:2x2
jax: 0.10.0
libtpu: 0.0.40
codegen_flags: <defaults>
</compile_context>

<pallas_src>
import functools

import jax
import jax.numpy as jnp
import numpy as np
from jax.experimental import pallas as pl
from jax.experimental.pallas import tpu as pltpu


# ----------------------------- Pallas kernel ------------------------------ #
def _local_deep_rfm_kernel(xe_ref, wp_ref, wg_ref, bin_ref, wo_ref, out_ref,
                           *, G, I, Ng):
    """One (row-tile, block-b) grid step of the local RFM recurrence.

    xe_ref  : (tb, D + 2*I*G)   bf16  circularly extended input
    wp_ref  : (1, p, Dr)        bf16  inner weights acting on the window part
    wg_ref  : (1, G, Dr)        bf16  inner weights acting on the state part
    bin_ref : (1, 1, Dr)        f32   inner bias
    wo_ref  : (1, Dr, G)        bf16  outer weights (no bias)
    out_ref : (tb, D)           f32   local state; resident across the b axis,
                                      becomes the final (lane-dense) output.
    """
    b = pl.program_id(1)
    p = (2 * I + 1) * G
    off = I * G
    D = Ng * G

    # First block: the state is x itself (x[..., idy] laid out group-major is
    # exactly the (tb, D) output layout).
    @pl.when(b == 0)
    def _():
        out_ref[...] = xe_ref[:, off:off + D].astype(jnp.float32)

    wp = wp_ref[0]            # (p, Dr)  bf16
    wg = wg_ref[0]            # (G, Dr)  bf16
    wo = wo_ref[0]            # (Dr, G)  bf16
    bias = bin_ref[0]         # (1, Dr)  f32

    # Groups are independent: each group reads/writes only its own G lanes of
    # the state, and its p-window always comes from the original x, so the
    # in-place per-group update is exact.
    # TODO(synk): for very large Ng switch this static unroll to a fori_loop
    # with dynamic lane offsets.
    for gi in range(Ng):
        lo = gi * G
        window = xe_ref[:, lo:lo + p]                          # (tb, p)  bf16
        state = out_ref[:, lo:lo + G].astype(jnp.bfloat16)     # (tb, G)
        h = (jnp.dot(window, wp, preferred_element_type=jnp.float32)
             + jnp.dot(state, wg, preferred_element_type=jnp.float32)
             + bias)                                           # (tb, Dr) f32
        z = jnp.tanh(h).astype(jnp.bfloat16)
        out_ref[:, lo:lo + G] = jnp.dot(z, wo,
                                        preferred_element_type=jnp.float32)


# ------------------------------- wrapper ----------------------------------- #
def local_deep_rfm_forward(x, params, *, D, D_r, B, G, I, tb=512):
    """Pallas implementation of LocalDeepRFM.forward.

    x : (..., D) float32
    params : dict with
        W_in  : (B, D_r, q)   q = 2*(I+1)*G
        b_in  : (B, D_r)
        W_out : (B, G, D_r)
    returns : (..., D) float32

    tb: row tile (rows = flattened batch).  512-1024 is a good default on
    v5e/v6e, 256-512 on v7x; it is clamped (multiple of 8) for small inputs.
    """
    assert D % G == 0
    Ng = D // G
    p = (2 * I + 1) * G
    De = D + 2 * I * G

    lead = x.shape[:-1]
    Mb = int(np.prod(lead, dtype=np.int64)) if lead else 1

    # Circular extension x_ext[..., j] = x[..., (j - I*G) % D].  Replaces the
    # (2I+1)x gather blow-up: group gi's window is x_ext[:, gi*G : gi*G + p].
    ext_idx = np.arange(-I * G, D + I * G) % D                  # (De,)
    x2 = x.reshape(Mb, D)
    x_ext = x2[:, jnp.asarray(ext_idx)].astype(jnp.bfloat16)    # (Mb, De)

    # Row tile: large, multiple of 8 sublanes, clamped for tiny problems.
    tb = int(max(8, min(tb, ((Mb + 7) // 8) * 8)))
    tb -= tb % 8
    Mb_pad = ((Mb + tb - 1) // tb) * tb
    if Mb_pad != Mb:
        x_ext = jnp.pad(x_ext, ((0, Mb_pad - Mb), (0, 0)))

    # Weights: pre-transpose to row-major x @ W form, split window/state parts,
    # zero-pad D_r up to a lane multiple (padded features stay exactly zero
    # through bias, tanh and W_out), cast MXU operands to bf16.
    D_r_pad = ((D_r + 127) // 128) * 128
    pad_r = D_r_pad - D_r
    W_in = params["W_in"]                                   # (B, D_r, q)
    Wp = jnp.transpose(W_in[:, :, :p], (0, 2, 1))           # (B, p, D_r)
    Wg = jnp.transpose(W_in[:, :, p:], (0, 2, 1))           # (B, G, D_r)
    Wo = jnp.transpose(params["W_out"], (0, 2, 1))          # (B, D_r, G)
    b_in = params["b_in"]                                   # (B, D_r)
    if pad_r:
        Wp = jnp.pad(Wp, ((0, 0), (0, 0), (0, pad_r)))
        Wg = jnp.pad(Wg, ((0, 0), (0, 0), (0, pad_r)))
        Wo = jnp.pad(Wo, ((0, 0), (0, pad_r), (0, 0)))
        b_in = jnp.pad(b_in, ((0, 0), (0, pad_r)))
    Wp = Wp.astype(jnp.bfloat16)
    Wg = Wg.astype(jnp.bfloat16)
    Wo = Wo.astype(jnp.bfloat16)
    b_in = b_in.reshape(B, 1, D_r_pad).astype(jnp.float32)  # keep bias in f32

    # Explicit VMEM budget: double-buffered x_ext tile + resident out block
    # (+ its buffer) + double-buffered per-b weight slices + headroom.
    per_b_w = (p * D_r_pad + G * D_r_pad + D_r_pad * G) * 2 + D_r_pad * 4
    vmem_needed = 2 * tb * De * 2 + 2 * tb * D * 4 + 2 * per_b_w + (8 << 20)
    vmem_limit = int(min(64 << 20, max(32 << 20, vmem_needed)))

    kernel = functools.partial(_local_deep_rfm_kernel, G=G, I=I, Ng=Ng)

    out = pl.pallas_call(
        kernel,
        out_shape=jax.ShapeDtypeStruct((Mb_pad, D), jnp.float32),
        grid=(Mb_pad // tb, B),                 # b innermost -> sequential rec.
        in_specs=[
            pl.BlockSpec((tb, De), lambda i, b: (i, 0)),            # x_ext tile
            pl.BlockSpec((1, p, D_r_pad), lambda i, b: (b, 0, 0)),  # W_in (win)
            pl.BlockSpec((1, G, D_r_pad), lambda i, b: (b, 0, 0)),  # W_in (state)
            pl.BlockSpec((1, 1, D_r_pad), lambda i, b: (b, 0, 0)),  # b_in
            pl.BlockSpec((1, D_r_pad, G), lambda i, b: (b, 0, 0)),  # W_out
        ],
        out_specs=pl.BlockSpec((tb, D), lambda i, b: (i, 0)),
        compiler_params=pltpu.CompilerParams(
            dimension_semantics=("parallel", "arbitrary"),
            vmem_limit_bytes=vmem_limit),
    )(x_ext, Wp, Wg, b_in, Wo)

    out = out[:Mb]                              # drop row padding
    return out.reshape(*lead, D)                # == y[..., p:q].flatten(-2,-1)


# ----------------------- pure-JAX reference (for check) -------------------- #
def local_deep_rfm_reference(x, params, *, D, D_r, B, G, I):
    Ng = D // G
    p = (2 * I + 1) * G
    q = p + G
    base_idx = np.arange(-I * G, (I + 1) * G) % D
    idx = np.stack([(base_idx + i * G) % D for i in range(Ng)])
    base_idy = np.arange(0, G)
    idy = np.stack([(base_idy + i * G) % D for i in range(Ng)])

    y = jnp.concatenate([x[..., jnp.asarray(idx)], x[..., jnp.asarray(idy)]],
                        axis=-1)                               # (..., Ng, q)
    for i in range(B):
        z = jnp.tanh(jnp.einsum("...q,rq->...r", y, params["W_in"][i])
                     + params["b_in"][i])
        g = jnp.einsum("...r,gr->...g", z, params["W_out"][i])
        y = y.at[..., p:q].set(g)
    return y[..., p:q].reshape(*y.shape[:-2], -1)


# --------------------------------- main ------------------------------------ #
if __name__ == "__main__":
    # Small, module-consistent hyperparameters.
    D, D_r, B, G, I = 16, 32, 3, 4, 1        # Ng = 4, p = 12, q = 16
    q = 2 * (I + 1) * G

    key = jax.random.PRNGKey(0)
    kx, kw, kb, ko = jax.random.split(key, 4)

    # Deterministic nn.Linear-style init (uniform in +-1/sqrt(fan_in)).
    bound_in = 1.0 / np.sqrt(q)
    bound_out = 1.0 / np.sqrt(D_r)
    params = {
        "W_in": jax.random.uniform(kw, (B, D_r, q), jnp.float32,
                                   -bound_in, bound_in),
        "b_in": jax.random.uniform(kb, (B, D_r), jnp.float32,
                                   -bound_in, bound_in),
        "W_out": jax.random.uniform(ko, (B, G, D_r), jnp.float32,
                                    -bound_out, bound_out),
    }

    # Input: (batch..., D) — two leading batch dims to exercise broadcasting.
    x = jax.random.normal(kx, (2, 8, D), jnp.float32)

    out = local_deep_rfm_forward(x, params, D=D, D_r=D_r, B=B, G=G, I=I)
    out = jax.block_until_ready(out)

    ref = jax.block_until_ready(
        local_deep_rfm_reference(x, params, D=D, D_r=D_r, B=B, G=G, I=I))

    assert out.shape == (2, 8, D), out.shape
    # Loosened tolerance: MXU operands are bf16 (accumulation / bias / tanh in f32).
    np.testing.assert_allclose(np.asarray(out), np.asarray(ref),
                               rtol=5e-2, atol=5e-2)
    print("KERNEL_OK")
</pallas_src>

<mosaic_0001>
module attributes {stable_mosaic.version = 11 : i64} {
  func.func @_local_deep_rfm_kernel(%arg0: i32, %arg1: i32, %arg2: memref<16x24xbf16, #tpu.memory_space<vmem>>, %arg3: memref<1x12x128xbf16, #tpu.memory_space<vmem>>, %arg4: memref<1x4x128xbf16, #tpu.memory_space<vmem>>, %arg5: memref<1x1x128xf32, #tpu.memory_space<vmem>>, %arg6: memref<1x128x4xbf16, #tpu.memory_space<vmem>>, %arg7: memref<16x16xf32, #tpu.memory_space<vmem>>) attributes {dimension_semantics = [#tpu.dimension_semantics<parallel>, #tpu.dimension_semantics<arbitrary>], iteration_bounds = array<i64: 1, 3>, scalar_prefetch = 0 : i64, scratch_operands = 0 : i64, tpu.core_type = #tpu.core_type<tc>, window_params = [{transform_indices = @transform_0, window_bounds = array<i64: 16, 24>}, {transform_indices = @transform_1, window_bounds = array<i64: 1, 12, 128>}, {transform_indices = @transform_2, window_bounds = array<i64: 1, 4, 128>}, {transform_indices = @transform_3, window_bounds = array<i64: 1, 1, 128>}, {transform_indices = @transform_4, window_bounds = array<i64: 1, 128, 4>}, {transform_indices = @transform_5, window_bounds = array<i64: 16, 16>}]} {
    %c0_i32 = arith.constant 0 : i32
    %0 = arith.cmpi eq, %arg1, %c0_i32 : i32
    %1 = arith.extui %0 : i1 to i32
    %c0_i32_0 = arith.constant 0 : i32
    %2 = arith.cmpi ne, %1, %c0_i32_0 : i32
    scf.if %2 {
      %c0_44 = arith.constant 0 : index
      %c4_45 = arith.constant 4 : index
      %59 = vector.load %arg2[%c0_44, %c4_45] : memref<16x24xbf16, #tpu.memory_space<vmem>>, vector<16x16xbf16>
      %60 = arith.extf %59 : vector<16x16xbf16> to vector<16x16xf32>
      %c0_46 = arith.constant 0 : index
      %c0_47 = arith.constant 0 : index
      %61 = vector.load %arg7[%c0_46, %c0_47] : memref<16x16xf32, #tpu.memory_space<vmem>>, vector<16x16xf32>
      tpu.vector_store %arg7[%c0_46, %c0_47], %60 {strides = array<i32>} : memref<16x16xf32, #tpu.memory_space<vmem>>, vector<16x16xf32>,
    } else {
    }
    %c0 = arith.constant 0 : index
    %c0_1 = arith.constant 0 : index
    %c0_2 = arith.constant 0 : index
    %3 = vector.load %arg3[%c0, %c0_1, %c0_2] : memref<1x12x128xbf16, #tpu.memory_space<vmem>>, vector<1x12x128xbf16>
    %4 = vector.shape_cast %3 : vector<1x12x128xbf16> to vector<12x128xbf16>
    %c0_3 = arith.constant 0 : index
    %c0_4 = arith.constant 0 : index
    %c0_5 = arith.constant 0 : index
    %5 = vector.load %arg4[%c0_3, %c0_4, %c0_5] : memref<1x4x128xbf16, #tpu.memory_space<vmem>>, vector<1x4x128xbf16>
    %6 = vector.shape_cast %5 : vector<1x4x128xbf16> to vector<4x128xbf16>
    %c0_6 = arith.constant 0 : index
    %c0_7 = arith.constant 0 : index
    %c0_8 = arith.constant 0 : index
    %7 = vector.load %arg6[%c0_6, %c0_7, %c0_8] : memref<1x128x4xbf16, #tpu.memory_space<vmem>>, vector<1x128x4xbf16>
    %8 = vector.shape_cast %7 : vector<1x128x4xbf16> to vector<128x4xbf16>
    %c0_9 = arith.constant 0 : index
    %c0_10 = arith.constant 0 : index
    %c0_11 = arith.constant 0 : index
    %9 = vector.load %arg5[%c0_9, %c0_10, %c0_11] : memref<1x1x128xf32, #tpu.memory_space<vmem>>, vector<1x1x128xf32>
    %10 = vector.shape_cast %9 : vector<1x1x128xf32> to vector<1x128xf32>
    %c0_12 = arith.constant 0 : index
    %c0_13 = arith.constant 0 : index
    %11 = vector.load %arg2[%c0_12, %c0_13] : memref<16x24xbf16, #tpu.memory_space<vmem>>, vector<16x12xbf16>
    %c0_14 = arith.constant 0 : index
    %c0_15 = arith.constant 0 : index
    %12 = vector.load %arg7[%c0_14, %c0_15] : memref<16x16xf32, #tpu.memory_space<vmem>>, vector<16x4xf32>
    %13 = arith.truncf %12 : vector<16x4xf32> to vector<16x4xbf16>
    %cst = arith.constant dense<0.000000e+00> : vector<16x128xf32>
    %14 = tpu.matmul %11, %4, %cst {dimension_numbers = #tpu.dot_dimension_numbers<[1], [0], [0], [1], [0, 0, 1, 1], [], []>} : vector<16x12xbf16>, vector<12x128xbf16>, vector<16x128xf32> -> vector<16x128xf32>
    %cst_16 = arith.constant dense<0.000000e+00> : vector<16x128xf32>
    %15 = tpu.matmul %13, %6, %cst_16 {dimension_numbers = #tpu.dot_dimension_numbers<[1], [0], [0], [1], [0, 0, 1, 1], [], []>} : vector<16x4xbf16>, vector<4x128xbf16>, vector<16x128xf32> -> vector<16x128xf32>
    %16 = arith.addf %14, %15 : vector<16x128xf32>
    %17 = vector.broadcast %10 : vector<1x128xf32> to vector<16x128xf32>
    %18 = arith.addf %16, %17 : vector<16x128xf32>
    %19 = math.tanh %18 : vector<16x128xf32>
    %20 = arith.truncf %19 : vector<16x128xf32> to vector<16x128xbf16>
    %cst_17 = arith.constant dense<0.000000e+00> : vector<16x4xf32>
    %21 = tpu.matmul %20, %8, %cst_17 {dimension_numbers = #tpu.dot_dimension_numbers<[1], [0], [0], [1], [0, 0, 1, 1], [], []>} : vector<16x128xbf16>, vector<128x4xbf16>, vector<16x4xf32> -> vector<16x4xf32>
    %c0_18 = arith.constant 0 : index
    %c0_19 = arith.constant 0 : index
    %22 = vector.load %arg7[%c0_18, %c0_19] : memref<16x16xf32, #tpu.memory_space<vmem>>, vector<16x4xf32>
    tpu.vector_store %arg7[%c0_18, %c0_19], %21 {strides = array<i32>} : memref<16x16xf32, #tpu.memory_space<vmem>>, vector<16x4xf32>,
    %c0_20 = arith.constant 0 : index
    %c4 = arith.constant 4 : index
    %23 = vector.load %arg2[%c0_20, %c4] : memref<16x24xbf16, #tpu.memory_space<vmem>>, vector<16x12xbf16>
    %c0_21 = arith.constant 0 : index
    %c4_22 = arith.constant 4 : index
    %24 = vector.load %arg7[%c0_21, %c4_22] : memref<16x16xf32, #tpu.memory_space<vmem>>, vector<16x4xf32>
    %25 = arith.truncf %24 : vector<16x4xf32> to vector<16x4xbf16>
    %cst_23 = arith.constant dense<0.000000e+00> : vector<16x128xf32>
    %26 = tpu.matmul %23, %4, %cst_23 {dimension_numbers = #tpu.dot_dimension_numbers<[1], [0], [0], [1], [0, 0, 1, 1], [], []>} : vector<16x12xbf16>, vector<12x128xbf16>, vector<16x128xf32> -> vector<16x128xf32>
    %cst_24 = arith.constant dense<0.000000e+00> : vector<16x128xf32>
    %27 = tpu.matmul %25, %6, %cst_24 {dimension_numbers = #tpu.dot_dimension_numbers<[1], [0], [0], [1], [0, 0, 1, 1], [], []>} : vector<16x4xbf16>, vector<4x128xbf16>, vector<16x128xf32> -> vector<16x128xf32>
    %28 = arith.addf %26, %27 : vector<16x128xf32>
    %29 = vector.broadcast %10 : vector<1x128xf32> to vector<16x128xf32>
    %30 = arith.addf %28, %29 : vector<16x128xf32>
    %31 = math.tanh %30 : vector<16x128xf32>
    %32 = arith.truncf %31 : vector<16x128xf32> to vector<16x128xbf16>
    %cst_25 = arith.constant dense<0.000000e+00> : vector<16x4xf32>
    %33 = tpu.matmul %32, %8, %cst_25 {dimension_numbers = #tpu.dot_dimension_numbers<[1], [0], [0], [1], [0, 0, 1, 1], [], []>} : vector<16x128xbf16>, vector<128x4xbf16>, vector<16x4xf32> -> vector<16x4xf32>
    %c0_26 = arith.constant 0 : index
    %c4_27 = arith.constant 4 : index
    %34 = vector.load %arg7[%c0_26, %c4_27] : memref<16x16xf32, #tpu.memory_space<vmem>>, vector<16x4xf32>
    tpu.vector_store %arg7[%c0_26, %c4_27], %33 {strides = array<i32>} : memref<16x16xf32, #tpu.memory_space<vmem>>, vector<16x4xf32>,
    %c0_28 = arith.constant 0 : index
    %c8 = arith.constant 8 : index
    %35 = vector.load %arg2[%c0_28, %c8] : memref<16x24xbf16, #tpu.memory_space<vmem>>, vector<16x12xbf16>
    %c0_29 = arith.constant 0 : index
    %c8_30 = arith.constant 8 : index
    %36 = vector.load %arg7[%c0_29, %c8_30] : memref<16x16xf32, #tpu.memory_space<vmem>>, vector<16x4xf32>
    %37 = arith.truncf %36 : vector<16x4xf32> to vector<16x4xbf16>
    %cst_31 = arith.constant dense<0.000000e+00> : vector<16x128xf32>
    %38 = tpu.matmul %35, %4, %cst_31 {dimension_numbers = #tpu.dot_dimension_numbers<[1], [0], [0], [1], [0, 0, 1, 1], [], []>} : vector<16x12xbf16>, vector<12x128xbf16>, vector<16x128xf32> -> vector<16x128xf32>
    %cst_32 = arith.constant dense<0.000000e+00> : vector<16x128xf32>
    %39 = tpu.matmul %37, %6, %cst_32 {dimension_numbers = #tpu.dot_dimension_numbers<[1], [0], [0], [1], [0, 0, 1, 1], [], []>} : vector<16x4xbf16>, vector<4x128xbf16>, vector<16x128xf32> -> vector<16x128xf32>
    %40 = arith.addf %38, %39 : vector<16x128xf32>
    %41 = vector.broadcast %10 : vector<1x128xf32> to vector<16x128xf32>
    %42 = arith.addf %40, %41 : vector<16x128xf32>
    %43 = math.tanh %42 : vector<16x128xf32>
    %44 = arith.truncf %43 : vector<16x128xf32> to vector<16x128xbf16>
    %cst_33 = arith.constant dense<0.000000e+00> : vector<16x4xf32>
    %45 = tpu.matmul %44, %8, %cst_33 {dimension_numbers = #tpu.dot_dimension_numbers<[1], [0], [0], [1], [0, 0, 1, 1], [], []>} : vector<16x128xbf16>, vector<128x4xbf16>, vector<16x4xf32> -> vector<16x4xf32>
    %c0_34 = arith.constant 0 : index
    %c8_35 = arith.constant 8 : index
    %46 = vector.load %arg7[%c0_34, %c8_35] : memref<16x16xf32, #tpu.memory_space<vmem>>, vector<16x4xf32>
    tpu.vector_store %arg7[%c0_34, %c8_35], %45 {strides = array<i32>} : memref<16x16xf32, #tpu.memory_space<vmem>>, vector<16x4xf32>,
    %c0_36 = arith.constant 0 : index
    %c12 = arith.constant 12 : index
    %47 = vector.load %arg2[%c0_36, %c12] : memref<16x24xbf16, #tpu.memory_space<vmem>>, vector<16x12xbf16>
    %c0_37 = arith.constant 0 : index
    %c12_38 = arith.constant 12 : index
    %48 = vector.load %arg7[%c0_37, %c12_38] : memref<16x16xf32, #tpu.memory_space<vmem>>, vector<16x4xf32>
    %49 = arith.truncf %48 : vector<16x4xf32> to vector<16x4xbf16>
    %cst_39 = arith.constant dense<0.000000e+00> : vector<16x128xf32>
    %50 = tpu.matmul %47, %4, %cst_39 {dimension_numbers = #tpu.dot_dimension_numbers<[1], [0], [0], [1], [0, 0, 1, 1], [], []>} : vector<16x12xbf16>, vector<12x128xbf16>, vector<16x128xf32> -> vector<16x128xf32>
    %cst_40 = arith.constant dense<0.000000e+00> : vector<16x128xf32>
    %51 = tpu.matmul %49, %6, %cst_40 {dimension_numbers = #tpu.dot_dimension_numbers<[1], [0], [0], [1], [0, 0, 1, 1], [], []>} : vector<16x4xbf16>, vector<4x128xbf16>, vector<16x128xf32> -> vector<16x128xf32>
    %52 = arith.addf %50, %51 : vector<16x128xf32>
    %53 = vector.broadcast %10 : vector<1x128xf32> to vector<16x128xf32>
    %54 = arith.addf %52, %53 : vector<16x128xf32>
    %55 = math.tanh %54 : vector<16x128xf32>
    %56 = arith.truncf %55 : vector<16x128xf32> to vector<16x128xbf16>
    %cst_41 = arith.constant dense<0.000000e+00> : vector<16x4xf32>
    %57 = tpu.matmul %56, %8, %cst_41 {dimension_numbers = #tpu.dot_dimension_numbers<[1], [0], [0], [1], [0, 0, 1, 1], [], []>} : vector<16x128xbf16>, vector<128x4xbf16>, vector<16x4xf32> -> vector<16x4xf32>
    %c0_42 = arith.constant 0 : index
    %c12_43 = arith.constant 12 : index
    %58 = vector.load %arg7[%c0_42, %c12_43] : memref<16x16xf32, #tpu.memory_space<vmem>>, vector<16x4xf32>
    tpu.vector_store %arg7[%c0_42, %c12_43], %57 {strides = array<i32>} : memref<16x16xf32, #tpu.memory_space<vmem>>, vector<16x4xf32>,
    return
  }
  func.func @transform_0(%arg0: i32, %arg1: i32) -> (i32, i32) {
    %c0_i32 = arith.constant 0 : i32
    %c0_i32_0 = arith.constant 0 : i32
    return %arg0, %c0_i32 : i32, i32
  }
  func.func @transform_1(%arg0: i32, %arg1: i32) -> (i32, i32, i32) {
    %c0_i32 = arith.constant 0 : i32
    %c0_i32_0 = arith.constant 0 : i32
    %c0_i32_1 = arith.constant 0 : i32
    return %arg1, %c0_i32, %c0_i32_0 : i32, i32, i32
  }
  func.func @transform_2(%arg0: i32, %arg1: i32) -> (i32, i32, i32) {
    %c0_i32 = arith.constant 0 : i32
    %c0_i32_0 = arith.constant 0 : i32
    %c0_i32_1 = arith.constant 0 : i32
    return %arg1, %c0_i32, %c0_i32_0 : i32, i32, i32
  }
  func.func @transform_3(%arg0: i32, %arg1: i32) -> (i32, i32, i32) {
    %c0_i32 = arith.constant 0 : i32
    %c0_i32_0 = arith.constant 0 : i32
    %c0_i32_1 = arith.constant 0 : i32
    return %arg1, %c0_i32, %c0_i32_0 : i32, i32, i32
  }
  func.func @transform_4(%arg0: i32, %arg1: i32) -> (i32, i32, i32) {
    %c0_i32 = arith.constant 0 : i32
    %c0_i32_0 = arith.constant 0 : i32
    %c0_i32_1 = arith.constant 0 : i32
    return %arg1, %c0_i32, %c0_i32_0 : i32, i32, i32
  }
  func.func @transform_5(%arg0: i32, %arg1: i32) -> (i32, i32) {
    %c0_i32 = arith.constant 0 : i32
    %c0_i32_0 = arith.constant 0 : i32
    return %arg0, %c0_i32 : i32, i32
  }
}

</mosaic_0001>

<bundles_post_ra>
// kernel: tpu_custom_call.1
= control target key start
LH: loop header
LB: loop body
LE: loop exit
PB: predicated region body
PF: predicated region fallthrough
CT: control target
= control target key end

     0   :  { %10 = vsyncpa [#allocation3], 0  ;;  %s1072_s18 = smov 0   ;;  %s1074_s19 = smov 0   ;;  %s1188_s0 = inlined_call_operand.vmem [shape: bf16[16,24], index: 0, kind: input, shape index: {}]   ;;  %s1189_s1 = inlined_call_operand.vmem [shape: bf16[3,12,128], index: 1, kind: input, shape index: {}]   ;;  %s1190_s2 = inlined_call_operand.vmem [shape: bf16[3,4,128], index: 2, kind: input, shape index: {}]   ;;  %s1191_s3 = inlined_call_operand.vmem [shape: f32[3,1,128], index: 3, kind: input, shape index: {}]   ;;  %s1192_s4 = inlined_call_operand.vmem [shape: bf16[3,128,4], index: 4, kind: input, shape index: {}]   ;;  %s1193_s5 = inlined_call_operand.hbm [shape: f32[16,16], index: 5, kind: output, shape index: {}]  }
   0x1   :  { %s1076_s20 = smov 0  }
   0x2 LB: > { %s822_s21 = sadd.s32 4294967295, %s1031_s20   ;;  %s25_s22 = sadd.s32 1, %s1027_s19  ;;  %s1031_s20 = sphi %s1076_s20, %s16_s20   ;;  %s1027_s19 = sphi %s1074_s19, %s1195_s19   ;;  %s1023_s18 = sphi %s1072_s18, %s1194_s18  }
   0x3   : > { %p26_p0 = scmp.ge.s32.totalorder %s25_s22, 3  ;;  %p826_p1 = scmp.ge.s32.totalorder %s1031_s20, 1 }
   0x4   : > { %p238_p2 = scmp.lt.s32.totalorder %s1031_s20, 4 }
   0x5   : > { %s1197_s22 = smov (%p26_p0, %s25_s22), 0 }
   0x6   : > { %p239_p3 = pnand %p826_p1, %p238_p2 }
   0x7   : > { %p284_p4 = scmp.lt.s32.totalorder (!%p239_p3), %s1023_s18, 2  ;;  %p832_p5 = scmp.ne.s32.totalorder (!%p239_p3), %s1023_s18, 0 }
   0x8   : > { %242 = sbr.rel (%p239_p3) target bundleno = 1983 (0x7bf), region = 40 }
   0xd   : > { %s1091_s23 = scalar_select %p284_p4, %s1023_s18, 2 }
   0xe   : > { %306 = sbr.rel (%p832_p5) target bundleno = 143 (0x8f), region = 44  ;;  %s1033_s16 = smov (!%p832_p5), 124  }
   0xf   : > { %s897_s24 = sshll.u32 %s1091_s23, 3  ;;  %s829_s25 = sshll.u32 %s1091_s23, 1 }
  0x10   : > { %s288_s28 = scalar_lea.vmem %s1189_s1, %s897_s24  ;;  %s292_s6 = scalar_lea.vmem %s1190_s2, %s829_s25 }
  0x11   : > { %s295_s9 = scalar_lea.vmem %s1191_s3, %s1091_s23  ;;  %s898_s10 = sshll.u32 %s1091_s23, 6 }
  0x12   : > { %s1109_s13 = scalar_lea.vmem %s1192_s4, %s898_s10 }
  0x13   : > { %v913_v0 = vld [vmem:[%s1188_s0] sm:$0xff]   ;;  %vm319_vm0 = vcmask 130048  }
  0x14   : > { %v914_v1 = vunpack.c.l.bf16 %v913_v0  ;;  %v915_v2 = vunpack.c.h.bf16 %v913_v0 }
  0x16   : > { %v955_v3 = vpack.i.bf16 %v915_v2, %v914_v1 }
  0x18   : > { %956 = vrot.lane.b32.xlu0 %v955_v3, %s1033_s16 }
  0x8a   : > { %v957_v4 = vpop.permute.xlu0 %956 }
  0x8b   : > { %v959_v5 = vunpack.i.h.bf16 %v957_v4  ;;  %v958_v6 = vunpack.i.l.bf16 %v957_v4 }
  0x8d   : > { %321 = vst.msk [vmem:[#allocation2 + $0x8] sm:$0xff] %vm319_vm0, %v959_v5 }
  0x8e   : > { %320 = vst.msk [vmem:[#allocation2] sm:$0xff] %vm319_vm0, %v958_v6 }
  0x8f PF: > { %v324_v7 = vld [vmem:[%s292_s6] sm:$0x3]  ;;  %vm351_vm1 = vcmask 1041408   ;;  %v899_v10 = vld [vmem:[%s288_s28] sm:$0x30]  ;;  %vm383_vm2 = vcmask 1045504  }
  0x90   : > { %v840_v8 = vld [vmem:[%s288_s28] sm:$0xf]  ;;  %v353_v9 = vsel %vm351_vm1, %v324_v7, 0  ;;  %vm347_vm3 = vcmask 31744   ;;  %v1115_v15 = vld [vmem:[%s1109_s13 + $0x38] sm:$0xff]  ;;  %vm379_vm4 = vcmask 97280  }
  0x91   : > { %362 = vmatpush.bf16.msra.mxu0 %v353_v9  ;;  %v841_v13 = vor.u32 %v899_v10, %v840_v8  ;;  %491 = vmatpush.bf16.msra.mxu3 %v353_v9  ;;  %v908_v17 = vld [vmem:[%s1188_s0] sm:$0xff]  ;;  %v906_v18 = vld [vmem:[%s1109_s13 + $0x30] sm:$0xff]  ;;  %v905_v19 = vld [vmem:[%s1109_s13 + $0x28] sm:$0xff]  ;;  %s1034_s23 = smov 124   ;;  %s1035_s28 = smov 4   ;;  %vm549_vm5 = vcmask 64544  }
  0x92   : > { %527 = vmatpush.bf16.msra.mxu1 %v1115_v15  ;;  %v904_v20 = vld [vmem:[%s1109_s13 + $0x20] sm:$0xff]  ;;  %v903_v21 = vld [vmem:[%s1109_s13 + $0x18] sm:$0xff]  ;;  %v902_v22 = vld [vmem:[%s1109_s13 + $0x10] sm:$0xff]  ;;  %s1036_s29 = smov 120   ;;  %s1037_s7 = smov 8   ;;  %vm628_vm6 = vcmask 97344  }
  0x93   : > { %v1117_v16 = vsel %vm383_vm2, %v841_v13, 0  ;;  %v901_v23 = vld [vmem:[%s1109_s13 + $0x8] sm:$0xff]  ;;  %v900_v24 = vld [vmem:[%s1109_s13] sm:$0xff]  ;;  %s1038_s10 = smov 116   ;;  %s1039_s11 = smov 12   ;;  %vm707_vm7 = vcmask 130144  }
  0x94   : > { %v345_v12 = vld [vmem:[#allocation2 + $0x8] sm:$0xff]  ;;  %394 = vmatpush.bf16.msra.mxu2 %v1117_v16  ;;  %v1142_v28 = vld [vmem:[%s295_s9] ss:$0 sm:$0xff]  ;;  %s1040_s12 = smov [#allocation2]   ;;  %s720_s16 = sshll.u32 %s1193_s5, 4  ;;  %s721_s16 = int_to_ptr.hbm [resolvable:$true] %s720_s16 }
  0x95   : > { %v344_v11 = vld [vmem:[#allocation2] sm:$0xff]  ;;  %570 = vmatpush.bf16.msrb.mxu3 %v353_v9  ;;  %515 = vmatpush.bf16.msrb.mxu0 %v1117_v16  ;;  %s718_s13 = sshll.u32 %s1040_s12, 4  ;;  %p920_p6 = scmp.eq.s32.totalorder %s822_s21, 2  ;;  %s719_s13 = int_to_ptr.vmem [resolvable:$true] %s718_s13 }
  0x96   : > { %v346_v14 = vpack.c.bf16 %v345_v12, %v344_v11  ;;  %528 = vmatpush.bf16.msra.mxu1 %v906_v18  ;;  %v909_v42 = vld [vmem:[%s1188_s0] sm:$0xff]  ;;  %s1041_s17 = smov 128  }
  0x97   : > { %842 = vmatmul.msk.bf16.vlgmr.msra.gmra.mxu2 %vm379_vm4, %v908_v17  ;;  %v910_v63 = vld [vmem:[%s1188_s0] sm:$0xff] }
  0x98   : > { %833 = vmatmul.msk.bf16.vlgmr.msra.gmra.mxu0 %vm347_vm3, %v346_v14  ;;  %457 = vmatpush.bf16.msrb.mxu2 %v1115_v15  ;;  %v911_v14 = vld [vmem:[%s1188_s0] sm:$0xff] }
  0x99   : > { %594 = vmatpush.bf16.msra.mxu0 %v1117_v16 }
  0x9a   : > { %529 = vmatpush.bf16.msra.mxu1 %v905_v19 }
  0x9c   : > { %458 = vmatpush.bf16.msrb.mxu2 %v906_v18 }
  0x9e   : > { %530 = vmatpush.bf16.msra.mxu1 %v904_v20 }
  0xa0   : > { %459 = vmatpush.bf16.msrb.mxu2 %v905_v19 }
  0xa2   : > { %531 = vmatpush.bf16.msra.mxu1 %v903_v21 }
  0xa4   : > { %460 = vmatpush.bf16.msrb.mxu2 %v904_v20 }
  0xa6   : > { %532 = vmatpush.bf16.msra.mxu1 %v902_v22 }
  0xa8   : > { %461 = vmatpush.bf16.msrb.mxu2 %v903_v21 }
  0xaa   : > { %533 = vmatpush.bf16.msra.mxu1 %v901_v23 }
  0xac   : > { %462 = vmatpush.bf16.msrb.mxu2 %v902_v22 }
  0xae   : > { %534 = vmatpush.bf16.msra.mxu1 %v900_v24 }
  0xb0   : > { %463 = vmatpush.bf16.msrb.mxu2 %v901_v23 }
  0xb2   : > { %685 = vmatpush.bf16.msrb.mxu1 %v1115_v15 }
  0xb4   : > { %464 = vmatpush.bf16.msrb.mxu2 %v900_v24 }
  0xb6   : > { %686 = vmatpush.bf16.msrb.mxu1 %v906_v18 }
  0xb8   : > { %649 = vmatpush.bf16.msra.mxu2 %v353_v9 }
  0xba   : > { %687 = vmatpush.bf16.msrb.mxu1 %v905_v19 }
  0xbe   : > { %688 = vmatpush.bf16.msrb.mxu1 %v904_v20 }
  0xc2   : > { %689 = vmatpush.bf16.msrb.mxu1 %v903_v21 }
  0xc6   : > { %690 = vmatpush.bf16.msrb.mxu1 %v902_v22 }
  0xca   : > { %691 = vmatpush.bf16.msrb.mxu1 %v901_v23 }
  0xce   : > { %692 = vmatpush.bf16.msrb.mxu1 %v900_v24 }
 0x115   : > { %v364_v25 = vpop.f32.mrf.mxu0 }
 0x11a   : > { %v396_v26 = vpop.f32.mrf.mxu2 }
 0x11b   : > { %v397_v27 = vadd.f32 %v396_v26, %v364_v25 }
 0x11d   : > { %v366_v29 = vpop.f32.mrf.mxu0  ;;  %v404_v30 = vadd.f32 %v1142_v28, %v397_v27 }
 0x11f   : > { %961 = vtanh.f32 %v404_v30 }
 0x122   : > { %v398_v31 = vpop.f32.mrf.mxu2 }
 0x123   : > { %v399_v32 = vadd.f32 %v398_v31, %v366_v29 }
 0x125   : > { %v405_v33 = vadd.f32 %v1142_v28, %v399_v32  ;;  %v962_v34 = vpop.eup %961 }
 0x127   : > { %963 = vtanh.f32 %v405_v33 }
 0x12d   : > { %v964_v35 = vpop.eup %963 }
 0x12e   : > { %v408_v36 = vpack.c.bf16 %v964_v35, %v962_v34 }
 0x130   : > { %465 = vmatmul.bf16.vlgmr.msrb.gmra.mxu2 %v408_v36 }
 0x1b3   : > { %v466_v37 = vpop.f32.mrf.mxu2 }
 0x1b4   : > { %471 = vst.msk [vmem:[#allocation2] sm:$0xff] %vm347_vm3, %v466_v37 }
 0x1bb   : > { %v468_v38 = vpop.f32.mrf.mxu2  ;;  %v475_v39 = vld [vmem:[#allocation2] sm:$0xff] }
 0x1bc   : > { %472 = vst.msk [vmem:[#allocation2 + $0x8] sm:$0xff] %vm347_vm3, %v468_v38 }
 0x1c3   : > { %v476_v40 = vld [vmem:[#allocation2 + $0x8] sm:$0xff] }
 0x1c4   : > { %v477_v41 = vpack.c.bf16 %v476_v40, %v475_v39 }
 0x1c6   : > { %479 = vrot.lane.b32.xlu0 %v477_v41, %s1034_s23 }
 0x1ce   : > { %503 = vrot.lane.b32.xlu0 %v909_v42, %s1034_s23 }
 0x238   : > { %v480_v43 = vpop.permute.xlu0 %479 }
 0x239   : > { %875 = vmatmul.msk.bf16.vlgmr.msra.gmra.mxu3 %vm347_vm3, %v480_v43 }
 0x23a   : > { %606 = vmatpush.bf16.msra.mxu3 %v1115_v15 }
 0x23e   : > { %607 = vmatpush.bf16.msra.mxu3 %v906_v18 }
 0x240   : > { %v504_v44 = vpop.permute.xlu0 %503 }
 0x241   : > { %880 = vmatmul.msk.bf16.vlgmr.msrb.gmra.mxu0 %vm379_vm4, %v504_v44 }
 0x242   : > { %608 = vmatpush.bf16.msra.mxu3 %v905_v19  ;;  %673 = vmatpush.bf16.msrb.mxu0 %v1117_v16 }
 0x246   : > { %609 = vmatpush.bf16.msra.mxu3 %v904_v20 }
 0x24a   : > { %610 = vmatpush.bf16.msra.mxu3 %v903_v21 }
 0x24e   : > { %611 = vmatpush.bf16.msra.mxu3 %v902_v22 }
 0x252   : > { %612 = vmatpush.bf16.msra.mxu3 %v901_v23 }
 0x256   : > { %613 = vmatpush.bf16.msra.mxu3 %v900_v24 }
 0x2bc   : > { %v493_v45 = vpop.f32.mrf.mxu3 }
 0x2be   : > { %v517_v46 = vpop.f32.mrf.mxu0 }
 0x2bf   : > { %v518_v47 = vadd.f32 %v517_v46, %v493_v45 }
 0x2c1   : > { %v522_v48 = vadd.f32 %v1142_v28, %v518_v47 }
 0x2c3   : > { %965 = vtanh.f32 %v522_v48 }
 0x2c4   : > { %v495_v49 = vpop.f32.mrf.mxu3 }
 0x2c6   : > { %v519_v50 = vpop.f32.mrf.mxu0 }
 0x2c7   : > { %v520_v51 = vadd.f32 %v519_v50, %v495_v49 }
 0x2c9   : > { %v523_v52 = vadd.f32 %v1142_v28, %v520_v51  ;;  %v966_v53 = vpop.eup %965 }
 0x2cb   : > { %967 = vtanh.f32 %v523_v52 }
 0x2d1   : > { %v968_v54 = vpop.eup %967 }
 0x2d2   : > { %v526_v55 = vpack.c.bf16 %v968_v54, %v966_v53 }
 0x2d4   : > { %535 = vmatmul.bf16.vlgmr.msra.gmra.mxu1 %v526_v55 }
 0x351   : > { %v536_v56 = vpop.f32.mrf.mxu1 }
 0x352   : > { %543 = vrot.lane.b32.xlu1 %v536_v56, %s1035_s28 }
 0x359   : > { %v538_v57 = vpop.f32.mrf.mxu1 }
 0x35a   : > { %545 = vrot.lane.b32.xlu1 %v538_v57, %s1035_s28 }
 0x3c4   : > { %v544_v58 = vpop.permute.xlu1 %543 }
 0x3c5   : > { %550 = vst.msk [vmem:[#allocation2] sm:$0xff] %vm549_vm5, %v544_v58 }
 0x3cc   : > { %v546_v59 = vpop.permute.xlu1 %545  ;;  %v554_v60 = vld [vmem:[#allocation2] sm:$0xff] }
 0x3cd   : > { %551 = vst.msk [vmem:[#allocation2 + $0x8] sm:$0xff] %vm549_vm5, %v546_v59 }
 0x3d4   : > { %v555_v61 = vld [vmem:[#allocation2 + $0x8] sm:$0xff] }
 0x3d5   : > { %v556_v62 = vpack.c.bf16 %v555_v61, %v554_v60 }
 0x3d7   : > { %558 = vrot.lane.b32.xlu2 %v556_v62, %s1036_s29 }
 0x3df   : > { %582 = vrot.lane.b32.xlu2 %v910_v63, %s1036_s29 }
 0x431   : > { %v559_v0 = vpop.permute.xlu2 %558 }
 0x432   : > { %881 = vmatmul.msk.bf16.vlgmr.msrb.gmra.mxu3 %vm347_vm3, %v559_v0 }
 0x439   : > { %v583_v1 = vpop.permute.xlu2 %582 }
 0x43a   : > { %886 = vmatmul.msk.bf16.vlgmr.msra.gmra.mxu0 %vm379_vm4, %v583_v1 }
 0x4b5   : > { %v572_v2 = vpop.f32.mrf.mxu3 }
 0x4b7   : > { %v596_v3 = vpop.f32.mrf.mxu0 }
 0x4b8   : > { %v597_v4 = vadd.f32 %v596_v3, %v572_v2 }
 0x4ba   : > { %v601_v5 = vadd.f32 %v1142_v28, %v597_v4 }
 0x4bc   : > { %969 = vtanh.f32 %v601_v5 }
 0x4bd   : > { %v574_v6 = vpop.f32.mrf.mxu3 }
 0x4bf   : > { %v598_v7 = vpop.f32.mrf.mxu0 }
 0x4c0   : > { %v599_v8 = vadd.f32 %v598_v7, %v574_v6 }
 0x4c2   : > { %v602_v9 = vadd.f32 %v1142_v28, %v599_v8  ;;  %v970_v10 = vpop.eup %969 }
 0x4c4   : > { %971 = vtanh.f32 %v602_v9 }
 0x4ca   : > { %v972_v11 = vpop.eup %971 }
 0x4cb   : > { %v605_v12 = vpack.c.bf16 %v972_v11, %v970_v10 }
 0x4cd   : > { %614 = vmatmul.bf16.vlgmr.msra.gmra.mxu3 %v605_v12 }
 0x550   : > { %v615_v13 = vpop.f32.mrf.mxu3 }
 0x551   : > { %622 = vrot.lane.b32.xlu0 %v615_v13, %s1037_s7 }
 0x558   : > { %v617_v15 = vpop.f32.mrf.mxu3 }
 0x559   : > { %624 = vrot.lane.b32.xlu1 %v617_v15, %s1037_s7  ;;  %661 = vrot.lane.b32.xlu0 %v911_v14, %s1038_s10 }
 0x5c3   : > { %v623_v16 = vpop.permute.xlu0 %622 }
 0x5c4   : > { %629 = vst.msk [vmem:[#allocation2] sm:$0xff] %vm628_vm6, %v623_v16 }
 0x5cb   : > { %v625_v17 = vpop.permute.xlu1 %624  ;;  %v662_v18 = vpop.permute.xlu0 %661  ;;  %v633_v19 = vld [vmem:[#allocation2] sm:$0xff] }
 0x5cc   : > { %630 = vst.msk [vmem:[#allocation2 + $0x8] sm:$0xff] %vm628_vm6, %v625_v17  ;;  %892 = vmatmul.msk.bf16.vlgmr.msrb.gmra.mxu0 %vm379_vm4, %v662_v18 }
 0x5d3   : > { %v634_v20 = vld [vmem:[#allocation2 + $0x8] sm:$0xff] }
 0x5d4   : > { %v635_v21 = vpack.c.bf16 %v634_v20, %v633_v19 }
 0x5d6   : > { %637 = vrot.lane.b32.xlu2 %v635_v21, %s1038_s10 }
 0x630   : > { %v638_v22 = vpop.permute.xlu2 %637 }
 0x631   : > { %887 = vmatmul.msk.bf16.vlgmr.msra.gmra.mxu2 %vm347_vm3, %v638_v22 }
 0x649   : > { %v675_v23 = vpop.f32.mrf.mxu0 }
 0x651   : > { %v677_v27 = vpop.f32.mrf.mxu0 }
 0x6b4   : > { %v651_v24 = vpop.f32.mrf.mxu2 }
 0x6b5   : > { %v676_v25 = vadd.f32 %v675_v23, %v651_v24 }
 0x6b7   : > { %v680_v26 = vadd.f32 %v1142_v28, %v676_v25 }
 0x6b9   : > { %973 = vtanh.f32 %v680_v26 }
 0x6bc   : > { %v653_v29 = vpop.f32.mrf.mxu2 }
 0x6bd   : > { %v678_v30 = vadd.f32 %v677_v27, %v653_v29 }
 0x6bf   : > { %v681_v31 = vadd.f32 %v1142_v28, %v678_v30  ;;  %v974_v32 = vpop.eup %973 }
 0x6c1   : > { %975 = vtanh.f32 %v681_v31 }
 0x6c7   : > { %v976_v33 = vpop.eup %975 }
 0x6c8   : > { %v684_v34 = vpack.c.bf16 %v976_v33, %v974_v32 }
 0x6ca   : > { %693 = vmatmul.bf16.vlgmr.msrb.gmra.mxu1 %v684_v34 }
 0x747   : > { %v694_v35 = vpop.f32.mrf.mxu1 }
 0x748   : > { %701 = vrot.lane.b32.xlu1 %v694_v35, %s1039_s11 }
 0x74f   : > { %v696_v36 = vpop.f32.mrf.mxu1 }
 0x750   : > { %703 = vrot.lane.b32.xlu2 %v696_v36, %s1039_s11 }
 0x7aa   : > { %v704_v37 = vpop.permute.xlu2 %703 }
 0x7ab   : > { %709 = vst.msk [vmem:[#allocation2 + $0x8] sm:$0xff] %vm707_vm7, %v704_v37 }
 0x7ba   : > { %v702_v28 = vpop.permute.xlu1 %701 }
 0x7bb   : > { %708 = vst.msk [vmem:[#allocation2] sm:$0xff] %vm707_vm7, %v702_v28 }
 0x7bc   : > { %917 = dma.vmem_to_hbm [thread:$0]  (%p920_p6), %s719_s13, 256, %s721_s16, [#allocation3], %s1041_s17, %s1041_s17, %s1037_s7  }
 0x7bd   : > { %1018 = dma.done.wait (%p920_p6), [#allocation3], 256  }
 0x7be   : > { %1020 = vsyncadd (%p920_p6), [#allocation3], 4294967040 }
 0x7bf PF: > { %s16_s20 = sadd.s32 1, %s1031_s20   ;;  %s1194_s18 = smov %s1027_s19 }
 0x7c0   : > { %p13_p7 = scmp.ge.s32.totalorder %s16_s20, 5   ;;  %s1195_s19 = smov %s1197_s22 }
 0x7c2   :  { %15 = sbr.rel (!%p13_p7) target bundleno = 2 (0x2), region = 84 }
 0x7c7   :  { %737 = vsyncpa [#allocation3], 1 }
 0x7c8   :  { %739 = vsyncpa [#allocation3 + $0x1], 1 }

</bundles_post_ra>
